<compile_context>
chip_gen: v6e
topology: v6e:2x2x1
jax: 0.10.0
libtpu: 0.0.40
codegen_flags: <defaults>
</compile_context>

<pallas_src>
import functools

import jax
import jax.numpy as jnp
from jax import lax
from jax.experimental import pallas as pl
from jax.experimental.pallas import tpu as pltpu


def _layer_norm(x, gamma, beta, eps=1e-6):
    # eps matches the PyTorch module: nn.LayerNorm(hidden_size, eps=1e-06).
    mean = jnp.mean(x, axis=-1, keepdims=True)
    var = jnp.mean((x - mean) ** 2, axis=-1, keepdims=True)
    return (x - mean) * lax.rsqrt(var + eps) * gamma + beta


def attention_kernel(q_ref, k_ref, v_ref, w_ref, consts_ref, out_ref,
                     attn_ref=None, *, batch, seq, hidden):
    """Single-step kernel: whole (tiny) problem lives in VMEM.

    q/k/v_ref  : (B*S, H) flattened tokens
    w_ref      : (5H, H)  stacked [wq * H^-0.5 | wk | wv | w1 | w2]
                          (all stored as (in, out), i.e. pre-transposed)
    consts_ref : (4, H)   rows = [b1, b2, gamma, beta]
    out_ref    : (B*S, H)
    attn_ref   : (B*S, S) optional attention-map output (reshaped by wrapper)
    """
    H = hidden
    q = q_ref[...]
    k = k_ref[...]
    v = v_ref[...]
    residual = q

    # Projections (scale for q already folded into the weight at init time).
    qw = jnp.dot(q, w_ref[0:H, :], preferred_element_type=jnp.float32)
    kw = jnp.dot(k, w_ref[H:2 * H, :], preferred_element_type=jnp.float32)
    vw = jnp.dot(v, w_ref[2 * H:3 * H, :], preferred_element_type=jnp.float32)

    outs = []
    for b in range(batch):                   # B is tiny and static: unroll.
        lo, hi = b * seq, (b + 1) * seq      # sublane-aligned static slices
        qb = qw[lo:hi, :]
        kb = kw[lo:hi, :]
        vb = vw[lo:hi, :]

        # q @ k^T without an explicit transpose: contract the last dims.
        s = lax.dot_general(qb, kb, (((1,), (1,)), ((), ())),
                            preferred_element_type=jnp.float32)

        # Numerically stable softmax.
        m = jnp.max(s, axis=-1, keepdims=True)
        e = jnp.exp(s - m)
        denom = jnp.sum(e, axis=-1, keepdims=True)

        if attn_ref is not None:
            # Exact normalization: the map is consumed downstream and must
            # match the reference (rows sum to 1).  Cost is negligible here.
            p = e / denom
            attn_ref[lo:hi, :] = p.astype(attn_ref.dtype)
        else:
            # Fast path: approximate reciprocal on the otherwise-idle EUP.
            p = e * pl.reciprocal(denom, approx=True)

        outs.append(jnp.dot(p, vb, preferred_element_type=jnp.float32))

    attn_out = jnp.concatenate(outs, axis=0)          # (B*S, H)

    b1 = consts_ref[0:1, :]
    b2 = consts_ref[1:2, :]
    gamma = consts_ref[2:3, :]
    beta = consts_ref[3:4, :]

    # Attention output + residual, then LayerNorm.
    x1 = _layer_norm(attn_out + residual, gamma, beta)

    # Feed-forward: lin_2(relu(lin_1(x))) + residual, then the same LayerNorm.
    h = jnp.maximum(
        jnp.dot(x1, w_ref[3 * H:4 * H, :],
                preferred_element_type=jnp.float32) + b1, 0.0)
    ff = jnp.dot(h, w_ref[4 * H:5 * H, :],
                 preferred_element_type=jnp.float32) + b2
    out2 = _layer_norm(ff + x1, gamma, beta)

    out_ref[...] = out2.astype(out_ref.dtype)


def prepare_params(wq, wk, wv, w1, b1, w2, b2, gamma, beta):
    """One-time module-init packing (NOT in the per-call path).

    Folds the attention score scale H^-0.5 into wq and stacks the five (H, H)
    weights into one (5H, H) slab and the four (H,) vectors into one (4, H)
    slab, so the kernel sees 5 input streams instead of 8+.
    """
    H = wq.shape[0]
    scale = jnp.asarray(H, jnp.float32) ** -0.5
    w_stack = jnp.concatenate([wq * scale, wk, wv, w1, w2], axis=0)  # (5H, H)
    consts = jnp.stack([b1, b2, gamma, beta], axis=0)                # (4, H)
    return w_stack, consts


@functools.partial(jax.jit, static_argnames=("return_attn",))
def attention_module(q, k, v, w_stack, consts, return_attn=True):
    B, S, H = q.shape
    n = B * S

    # (B, S, H) -> (B*S, H) is a free row-major reshape (no copy).
    q2 = q.reshape(n, H)
    k2 = k.reshape(n, H)
    v2 = v.reshape(n, H)

    vmem = pl.BlockSpec(memory_space=pltpu.MemorySpace.VMEM)

    out_shapes = [jax.ShapeDtypeStruct((n, H), jnp.float32)]
    out_specs = [vmem]
    if return_attn:
        out_shapes.append(jax.ShapeDtypeStruct((n, S), jnp.float32))
        out_specs.append(vmem)

    # Advisory cost hint so XLA schedules sensibly around this tiny call.
    flops = 2 * n * H * H * 5 + 2 * (2 * B * S * S * H)
    transcendentals = B * S * S + 2 * n + B * S
    bytes_accessed = 4 * (3 * n * H + 5 * H * H + 4 * H + n * H
                          + (n * S if return_attn else 0))

    kernel = functools.partial(attention_kernel, batch=B, seq=S, hidden=H)

    # Single grid step (no grid): everything fits in VMEM, nothing to pipeline.
    results = pl.pallas_call(
        kernel,
        out_shape=tuple(out_shapes),
        in_specs=[vmem] * 5,
        out_specs=tuple(out_specs),
        cost_estimate=pl.CostEstimate(flops=flops,
                                      transcendentals=transcendentals,
                                      bytes_accessed=bytes_accessed),
    )(q2, k2, v2, w_stack, consts)

    out = results[0].reshape(B, S, H)
    if return_attn:
        return out, results[1].reshape(B, S, S)
    return out


def reference_jax(q, k, v, wq, wk, wv, w1, b1, w2, b2, gamma, beta):
    H = q.shape[-1]
    residual = q
    qw = q @ wq
    kw = k @ wk
    vw = v @ wv
    scores = jnp.einsum("bqh,bkh->bqk", qw, kw) * (H ** -0.5)
    attn = jax.nn.softmax(scores, axis=-1)
    out = jnp.einsum("bqk,bkh->bqh", attn, vw) + residual
    x1 = _layer_norm(out, gamma, beta)
    ff = jnp.maximum(x1 @ w1 + b1, 0.0) @ w2 + b2
    out2 = _layer_norm(ff + x1, gamma, beta)
    return out2, attn


if __name__ == "__main__":
    B, S, H = 2, 8, 32

    key = jax.random.PRNGKey(0)
    keys = jax.random.split(key, 10)

    q = jax.random.normal(keys[0], (B, S, H), dtype=jnp.float32)
    k = jax.random.normal(keys[1], (B, S, H), dtype=jnp.float32)
    v = jax.random.normal(keys[2], (B, S, H), dtype=jnp.float32)

    scale = 1.0 / jnp.sqrt(H)
    # Weights stored as (in, out), i.e. already transposed vs. nn.Linear.
    wq = jax.random.uniform(keys[3], (H, H), minval=-scale, maxval=scale)
    wk = jax.random.uniform(keys[4], (H, H), minval=-scale, maxval=scale)
    wv = jax.random.uniform(keys[5], (H, H), minval=-scale, maxval=scale)
    w1 = jax.random.uniform(keys[6], (H, H), minval=-scale, maxval=scale)
    b1 = jax.random.uniform(keys[7], (H,), minval=-scale, maxval=scale)
    w2 = jax.random.uniform(keys[8], (H, H), minval=-scale, maxval=scale)
    b2 = jax.random.uniform(keys[9], (H,), minval=-scale, maxval=scale)
    gamma = jnp.ones((H,), dtype=jnp.float32)
    beta = jnp.zeros((H,), dtype=jnp.float32)

    # One-time packing at "module init": scale fold + weight/bias stacking.
    w_stack, consts = prepare_params(wq, wk, wv, w1, b1, w2, b2, gamma, beta)
    jax.block_until_ready((w_stack, consts))

    out, attn = attention_module(q, k, v, w_stack, consts)
    jax.block_until_ready((out, attn))

    ref_out, ref_attn = reference_jax(q, k, v, wq, wk, wv, w1, b1, w2, b2,
                                      gamma, beta)
    # Exact softmax normalization on this path -> tight tolerances.
    assert jnp.allclose(out, ref_out, atol=1e-3, rtol=1e-3)
    assert jnp.allclose(attn, ref_attn, atol=1e-4, rtol=1e-4)

    # Fast path: skips the attention-map writeback, uses EUP approx reciprocal.
    out_fast = attention_module(q, k, v, w_stack, consts, return_attn=False)
    jax.block_until_ready(out_fast)
    assert jnp.allclose(out_fast, ref_out, atol=2e-3, rtol=2e-3)

    print("KERNEL_OK")
</pallas_src>

<mosaic_0001>
module attributes {stable_mosaic.version = 11 : i64} {
  func.func @attention_kernel(%arg0: memref<16x32xf32, #tpu.memory_space<vmem>>, %arg1: memref<16x32xf32, #tpu.memory_space<vmem>>, %arg2: memref<16x32xf32, #tpu.memory_space<vmem>>, %arg3: memref<160x32xf32, #tpu.memory_space<vmem>>, %arg4: memref<4x32xf32, #tpu.memory_space<vmem>>, %arg5: memref<16x32xf32, #tpu.memory_space<vmem>>, %arg6: memref<16x8xf32, #tpu.memory_space<vmem>>) attributes {dimension_semantics = [], scalar_prefetch = 0 : i64, scratch_operands = 0 : i64, tpu.core_type = #tpu.core_type<tc>} {
    %c0 = arith.constant 0 : index
    %c0_0 = arith.constant 0 : index
    %0 = vector.load %arg0[%c0, %c0_0] : memref<16x32xf32, #tpu.memory_space<vmem>>, vector<16x32xf32>
    %c0_1 = arith.constant 0 : index
    %c0_2 = arith.constant 0 : index
    %1 = vector.load %arg1[%c0_1, %c0_2] : memref<16x32xf32, #tpu.memory_space<vmem>>, vector<16x32xf32>
    %c0_3 = arith.constant 0 : index
    %c0_4 = arith.constant 0 : index
    %2 = vector.load %arg2[%c0_3, %c0_4] : memref<16x32xf32, #tpu.memory_space<vmem>>, vector<16x32xf32>
    %c0_5 = arith.constant 0 : index
    %c0_6 = arith.constant 0 : index
    %3 = vector.load %arg3[%c0_5, %c0_6] : memref<160x32xf32, #tpu.memory_space<vmem>>, vector<32x32xf32>
    %cst = arith.constant dense<0.000000e+00> : vector<16x32xf32>
    %4 = tpu.matmul %0, %3, %cst {dimension_numbers = #tpu.dot_dimension_numbers<[1], [0], [0], [1], [0, 0, 1, 1], [], []>} : vector<16x32xf32>, vector<32x32xf32>, vector<16x32xf32> -> vector<16x32xf32>
    %c32 = arith.constant 32 : index
    %c0_7 = arith.constant 0 : index
    %5 = vector.load %arg3[%c32, %c0_7] : memref<160x32xf32, #tpu.memory_space<vmem>>, vector<32x32xf32>
    %cst_8 = arith.constant dense<0.000000e+00> : vector<16x32xf32>
    %6 = tpu.matmul %1, %5, %cst_8 {dimension_numbers = #tpu.dot_dimension_numbers<[1], [0], [0], [1], [0, 0, 1, 1], [], []>} : vector<16x32xf32>, vector<32x32xf32>, vector<16x32xf32> -> vector<16x32xf32>
    %c64 = arith.constant 64 : index
    %c0_9 = arith.constant 0 : index
    %7 = vector.load %arg3[%c64, %c0_9] : memref<160x32xf32, #tpu.memory_space<vmem>>, vector<32x32xf32>
    %cst_10 = arith.constant dense<0.000000e+00> : vector<16x32xf32>
    %8 = tpu.matmul %2, %7, %cst_10 {dimension_numbers = #tpu.dot_dimension_numbers<[1], [0], [0], [1], [0, 0, 1, 1], [], []>} : vector<16x32xf32>, vector<32x32xf32>, vector<16x32xf32> -> vector<16x32xf32>
    %9 = vector.extract_strided_slice %4 {offsets = [0, 0], sizes = [8, 32], strides = [1, 1]} : vector<16x32xf32> to vector<8x32xf32>
    %10 = vector.extract_strided_slice %6 {offsets = [0, 0], sizes = [8, 32], strides = [1, 1]} : vector<16x32xf32> to vector<8x32xf32>
    %11 = vector.extract_strided_slice %8 {offsets = [0, 0], sizes = [8, 32], strides = [1, 1]} : vector<16x32xf32> to vector<8x32xf32>
    %cst_11 = arith.constant dense<0.000000e+00> : vector<8x8xf32>
    %12 = tpu.matmul %9, %10, %cst_11 {dimension_numbers = #tpu.dot_dimension_numbers<[1], [1], [0], [0], [0, 0, 1, 0], [], []>} : vector<8x32xf32>, vector<8x32xf32>, vector<8x8xf32> -> vector<8x8xf32>
    %cst_12 = arith.constant dense<0xFF800000> : vector<8xf32>
    %13 = vector.multi_reduction <maximumf>, %12, %cst_12 [1] : vector<8x8xf32> to vector<8xf32>
    %14 = vector.shape_cast %13 : vector<8xf32> to vector<8x1xf32>
    %15 = vector.broadcast %14 : vector<8x1xf32> to vector<8x8xf32>
    %16 = arith.subf %12, %15 : vector<8x8xf32>
    %17 = math.exp %16 : vector<8x8xf32>
    %cst_13 = arith.constant dense<0.000000e+00> : vector<8xf32>
    %18 = vector.multi_reduction <add>, %17, %cst_13 [1] : vector<8x8xf32> to vector<8xf32>
    %19 = vector.shape_cast %18 : vector<8xf32> to vector<8x1xf32>
    %20 = vector.broadcast %19 : vector<8x1xf32> to vector<8x8xf32>
    %21 = arith.divf %17, %20 : vector<8x8xf32>
    %c0_14 = arith.constant 0 : index
    %c0_15 = arith.constant 0 : index
    %22 = vector.load %arg6[%c0_14, %c0_15] : memref<16x8xf32, #tpu.memory_space<vmem>>, vector<8x8xf32>
    tpu.vector_store %arg6[%c0_14, %c0_15], %21 {strides = array<i32>} : memref<16x8xf32, #tpu.memory_space<vmem>>, vector<8x8xf32>,
    %cst_16 = arith.constant dense<0.000000e+00> : vector<8x32xf32>
    %23 = tpu.matmul %21, %11, %cst_16 {dimension_numbers = #tpu.dot_dimension_numbers<[1], [0], [0], [1], [0, 0, 1, 1], [], []>} : vector<8x8xf32>, vector<8x32xf32>, vector<8x32xf32> -> vector<8x32xf32>
    %24 = vector.extract_strided_slice %4 {offsets = [8, 0], sizes = [8, 32], strides = [1, 1]} : vector<16x32xf32> to vector<8x32xf32>
    %25 = vector.extract_strided_slice %6 {offsets = [8, 0], sizes = [8, 32], strides = [1, 1]} : vector<16x32xf32> to vector<8x32xf32>
    %26 = vector.extract_strided_slice %8 {offsets = [8, 0], sizes = [8, 32], strides = [1, 1]} : vector<16x32xf32> to vector<8x32xf32>
    %cst_17 = arith.constant dense<0.000000e+00> : vector<8x8xf32>
    %27 = tpu.matmul %24, %25, %cst_17 {dimension_numbers = #tpu.dot_dimension_numbers<[1], [1], [0], [0], [0, 0, 1, 0], [], []>} : vector<8x32xf32>, vector<8x32xf32>, vector<8x8xf32> -> vector<8x8xf32>
    %cst_18 = arith.constant dense<0xFF800000> : vector<8xf32>
    %28 = vector.multi_reduction <maximumf>, %27, %cst_18 [1] : vector<8x8xf32> to vector<8xf32>
    %29 = vector.shape_cast %28 : vector<8xf32> to vector<8x1xf32>
    %30 = vector.broadcast %29 : vector<8x1xf32> to vector<8x8xf32>
    %31 = arith.subf %27, %30 : vector<8x8xf32>
    %32 = math.exp %31 : vector<8x8xf32>
    %cst_19 = arith.constant dense<0.000000e+00> : vector<8xf32>
    %33 = vector.multi_reduction <add>, %32, %cst_19 [1] : vector<8x8xf32> to vector<8xf32>
    %34 = vector.shape_cast %33 : vector<8xf32> to vector<8x1xf32>
    %35 = vector.broadcast %34 : vector<8x1xf32> to vector<8x8xf32>
    %36 = arith.divf %32, %35 : vector<8x8xf32>
    %c8 = arith.constant 8 : index
    %c0_20 = arith.constant 0 : index
    %37 = vector.load %arg6[%c8, %c0_20] : memref<16x8xf32, #tpu.memory_space<vmem>>, vector<8x8xf32>
    tpu.vector_store %arg6[%c8, %c0_20], %36 {strides = array<i32>} : memref<16x8xf32, #tpu.memory_space<vmem>>, vector<8x8xf32>,
    %cst_21 = arith.constant dense<0.000000e+00> : vector<8x32xf32>
    %38 = tpu.matmul %36, %26, %cst_21 {dimension_numbers = #tpu.dot_dimension_numbers<[1], [0], [0], [1], [0, 0, 1, 1], [], []>} : vector<8x8xf32>, vector<8x32xf32>, vector<8x32xf32> -> vector<8x32xf32>
    %39 = tpu.concatenate %23, %38 in 0 : vector<8x32xf32>, vector<8x32xf32> -> vector<16x32xf32>
    %c0_22 = arith.constant 0 : index
    %c0_23 = arith.constant 0 : index
    %40 = vector.load %arg4[%c0_22, %c0_23] : memref<4x32xf32, #tpu.memory_space<vmem>>, vector<1x32xf32>
    %c1 = arith.constant 1 : index
    %c0_24 = arith.constant 0 : index
    %41 = vector.load %arg4[%c1, %c0_24] : memref<4x32xf32, #tpu.memory_space<vmem>>, vector<1x32xf32>
    %c2 = arith.constant 2 : index
    %c0_25 = arith.constant 0 : index
    %42 = vector.load %arg4[%c2, %c0_25] : memref<4x32xf32, #tpu.memory_space<vmem>>, vector<1x32xf32>
    %c3 = arith.constant 3 : index
    %c0_26 = arith.constant 0 : index
    %43 = vector.load %arg4[%c3, %c0_26] : memref<4x32xf32, #tpu.memory_space<vmem>>, vector<1x32xf32>
    %44 = arith.addf %39, %0 : vector<16x32xf32>
    %cst_27 = arith.constant dense<0.000000e+00> : vector<16xf32>
    %45 = vector.multi_reduction <add>, %44, %cst_27 [1] : vector<16x32xf32> to vector<16xf32>
    %46 = vector.shape_cast %45 : vector<16xf32> to vector<16x1xf32>
    %cst_28 = arith.constant 3.200000e+01 : f32
    %47 = vector.broadcast %cst_28 : f32 to vector<16x1xf32>
    %48 = arith.divf %46, %47 : vector<16x1xf32>
    %49 = vector.broadcast %48 : vector<16x1xf32> to vector<16x32xf32>
    %50 = arith.subf %44, %49 : vector<16x32xf32>
    %51 = arith.mulf %50, %50 : vector<16x32xf32>
    %cst_29 = arith.constant dense<0.000000e+00> : vector<16xf32>
    %52 = vector.multi_reduction <add>, %51, %cst_29 [1] : vector<16x32xf32> to vector<16xf32>
    %53 = vector.shape_cast %52 : vector<16xf32> to vector<16x1xf32>
    %cst_30 = arith.constant 3.200000e+01 : f32
    %54 = vector.broadcast %cst_30 : f32 to vector<16x1xf32>
    %55 = arith.divf %53, %54 : vector<16x1xf32>
    %56 = vector.broadcast %48 : vector<16x1xf32> to vector<16x32xf32>
    %57 = arith.subf %44, %56 : vector<16x32xf32>
    %cst_31 = arith.constant 9.99999997E-7 : f32
    %58 = vector.broadcast %cst_31 : f32 to vector<16x1xf32>
    %59 = arith.addf %55, %58 : vector<16x1xf32>
    %60 = math.rsqrt %59 : vector<16x1xf32>
    %61 = vector.broadcast %60 : vector<16x1xf32> to vector<16x32xf32>
    %62 = arith.mulf %57, %61 : vector<16x32xf32>
    %63 = vector.broadcast %42 : vector<1x32xf32> to vector<16x32xf32>
    %64 = arith.mulf %62, %63 : vector<16x32xf32>
    %65 = vector.broadcast %43 : vector<1x32xf32> to vector<16x32xf32>
    %66 = arith.addf %64, %65 : vector<16x32xf32>
    %c96 = arith.constant 96 : index
    %c0_32 = arith.constant 0 : index
    %67 = vector.load %arg3[%c96, %c0_32] : memref<160x32xf32, #tpu.memory_space<vmem>>, vector<32x32xf32>
    %cst_33 = arith.constant dense<0.000000e+00> : vector<16x32xf32>
    %68 = tpu.matmul %66, %67, %cst_33 {dimension_numbers = #tpu.dot_dimension_numbers<[1], [0], [0], [1], [0, 0, 1, 1], [], []>} : vector<16x32xf32>, vector<32x32xf32>, vector<16x32xf32> -> vector<16x32xf32>
    %69 = vector.broadcast %40 : vector<1x32xf32> to vector<16x32xf32>
    %70 = arith.addf %68, %69 : vector<16x32xf32>
    %cst_34 = arith.constant 0.000000e+00 : f32
    %71 = vector.broadcast %cst_34 : f32 to vector<16x32xf32>
    %72 = arith.maximumf %70, %71 : vector<16x32xf32>
    %c128 = arith.constant 128 : index
    %c0_35 = arith.constant 0 : index
    %73 = vector.load %arg3[%c128, %c0_35] : memref<160x32xf32, #tpu.memory_space<vmem>>, vector<32x32xf32>
    %cst_36 = arith.constant dense<0.000000e+00> : vector<16x32xf32>
    %74 = tpu.matmul %72, %73, %cst_36 {dimension_numbers = #tpu.dot_dimension_numbers<[1], [0], [0], [1], [0, 0, 1, 1], [], []>} : vector<16x32xf32>, vector<32x32xf32>, vector<16x32xf32> -> vector<16x32xf32>
    %75 = vector.broadcast %41 : vector<1x32xf32> to vector<16x32xf32>
    %76 = arith.addf %74, %75 : vector<16x32xf32>
    %77 = arith.addf %76, %66 : vector<16x32xf32>
    %cst_37 = arith.constant dense<0.000000e+00> : vector<16xf32>
    %78 = vector.multi_reduction <add>, %77, %cst_37 [1] : vector<16x32xf32> to vector<16xf32>
    %79 = vector.shape_cast %78 : vector<16xf32> to vector<16x1xf32>
    %cst_38 = arith.constant 3.200000e+01 : f32
    %80 = vector.broadcast %cst_38 : f32 to vector<16x1xf32>
    %81 = arith.divf %79, %80 : vector<16x1xf32>
    %82 = vector.broadcast %81 : vector<16x1xf32> to vector<16x32xf32>
    %83 = arith.subf %77, %82 : vector<16x32xf32>
    %84 = arith.mulf %83, %83 : vector<16x32xf32>
    %cst_39 = arith.constant dense<0.000000e+00> : vector<16xf32>
    %85 = vector.multi_reduction <add>, %84, %cst_39 [1] : vector<16x32xf32> to vector<16xf32>
    %86 = vector.shape_cast %85 : vector<16xf32> to vector<16x1xf32>
    %cst_40 = arith.constant 3.200000e+01 : f32
    %87 = vector.broadcast %cst_40 : f32 to vector<16x1xf32>
    %88 = arith.divf %86, %87 : vector<16x1xf32>
    %89 = vector.broadcast %81 : vector<16x1xf32> to vector<16x32xf32>
    %90 = arith.subf %77, %89 : vector<16x32xf32>
    %cst_41 = arith.constant 9.99999997E-7 : f32
    %91 = vector.broadcast %cst_41 : f32 to vector<16x1xf32>
    %92 = arith.addf %88, %91 : vector<16x1xf32>
    %93 = math.rsqrt %92 : vector<16x1xf32>
    %94 = vector.broadcast %93 : vector<16x1xf32> to vector<16x32xf32>
    %95 = arith.mulf %90, %94 : vector<16x32xf32>
    %96 = vector.broadcast %42 : vector<1x32xf32> to vector<16x32xf32>
    %97 = arith.mulf %95, %96 : vector<16x32xf32>
    %98 = vector.broadcast %43 : vector<1x32xf32> to vector<16x32xf32>
    %99 = arith.addf %97, %98 : vector<16x32xf32>
    %c0_42 = arith.constant 0 : index
    %c0_43 = arith.constant 0 : index
    %100 = vector.load %arg5[%c0_42, %c0_43] : memref<16x32xf32, #tpu.memory_space<vmem>>, vector<16x32xf32>
    tpu.vector_store %arg5[%c0_42, %c0_43], %99 {strides = array<i32>} : memref<16x32xf32, #tpu.memory_space<vmem>>, vector<16x32xf32>,
    return
  }
}

</mosaic_0001>

<bundles_post_ra>
// kernel: attention_module.1
= control target key start
LH: loop header
LB: loop body
LE: loop exit
PB: predicated region body
PF: predicated region fallthrough
CT: control target
= control target key end

     0   :  { %12 = vsyncpa [#allocation3], 0  ;;  %vm34_vm0 = vcmask 261120   ;;  %s1298_s0 = inlined_call_operand.vmem [shape: f32[16,32], index: 0, kind: input, shape index: {}]   ;;  %s1299_s1 = inlined_call_operand.vmem [shape: f32[16,32], index: 1, kind: input, shape index: {}]   ;;  %s1300_s2 = inlined_call_operand.vmem [shape: f32[16,32], index: 2, kind: input, shape index: {}]   ;;  %s1301_s3 = inlined_call_operand.vmem [shape: f32[160,32], index: 3, kind: input, shape index: {}]   ;;  %s1302_s4 = inlined_call_operand.vmem [shape: f32[4,32], index: 4, kind: input, shape index: {}]   ;;  %s1303_s5 = inlined_call_operand.hbm [shape: f32[16,32], index: 5, kind: output, shape index: {0}]   ;;  %s1304_s6 = inlined_call_operand.hbm [shape: f32[16,8], index: 6, kind: output, shape index: {1}]  }
   0x1   :  { %v119_v0 = vld [vmem:[%s1301_s3 + $0x38] sm:$0xff]  ;;  %v118_v2 = vld [vmem:[%s1301_s3 + $0x30] sm:$0xff]  ;;  %v117_v4 = vld [vmem:[%s1301_s3 + $0x28] sm:$0xff] }
   0x2   :  { %v33_v1 = vld [vmem:[%s1301_s3 + $0x18] sm:$0xff]  ;;  %969 = vmatprep.subr.mxu1 %v119_v0  ;;  %v32_v3 = vld [vmem:[%s1301_s3 + $0x10] sm:$0xff]  ;;  %v31_v5 = vld [vmem:[%s1301_s3 + $0x8] sm:$0xff] }
   0x3   :  { %958 = vmatprep.subr.mxu0 %v33_v1  ;;  %970 = vmatpush3.msra.mxu1 %v119_v0  ;;  %v116_v6 = vld [vmem:[%s1301_s3 + $0x20] sm:$0xff] }
   0x4   :  { %959 = vmatpush3.msra.mxu0 %v33_v1  ;;  %971 = vmatprep.subr.mxu1 %v118_v2  ;;  %v26_v7 = vld [vmem:[%s1299_s1] sm:$0xff] }
   0x5   :  { %960 = vmatprep.subr.mxu0 %v32_v3  ;;  %972 = vmatpush3.msra.mxu1 %v118_v2  ;;  %v30_v8 = vld [vmem:[%s1301_s3] sm:$0xff] }
   0x6   :  { %961 = vmatpush3.msra.mxu0 %v32_v3  ;;  %973 = vmatprep.subr.mxu1 %v117_v4 }
   0x7   :  { %962 = vmatprep.subr.mxu0 %v31_v5 }
   0x8   :  { %13 = vsyncpa [#allocation5], 0  ;;  %974 = vmatpush3.msra.mxu1 %v117_v4  ;;  %963 = vmatpush3.msra.mxu0 %v31_v5  ;;  %v27_v9 = vld [vmem:[%s1299_s1 + $0x8] sm:$0xff]  ;;  %v1174_v10 = vld [vmem:[%s1298_s0] sm:$0xff]  ;;  %v1099_v18 = vmov 0.0   ;;  %vm1100_vm1 = vmmov 0  }
   0x9   :  { %975 = vmatprep.subr.mxu1 %v116_v6  ;;  %977 = vmatprep.mubr.msk.f32.mxu1 %vm34_vm0, %v26_v7  ;;  %v204_v11 = vld [vmem:[%s1301_s3 + $0x58] sm:$0xff]  ;;  %v1182_v12 = vld [vmem:[%s1298_s0 + $0x8] sm:$0xff]  ;;  %v28_v13 = vld [vmem:[%s1300_s2] sm:$0xff]  ;;  %vm362_vm2 = vcmask 64512  }
   0xa   :  { %976 = vmatpush3.msra.mxu1 %v116_v6  ;;  %964 = vmatprep.subr.mxu0 %v30_v8  ;;  %v203_v14 = vld [vmem:[%s1301_s3 + $0x50] sm:$0xff]  ;;  %v202_v15 = vld [vmem:[%s1301_s3 + $0x48] sm:$0xff]  ;;  %v201_v16 = vld [vmem:[%s1301_s3 + $0x40] sm:$0xff] }
   0xb   :  { %978 = vmatmul.mubr.msk.f32.vlgmr.msra.gmra.mxu1 %vm34_vm0, %v27_v9  ;;  %965 = vmatpush3.msra.mxu0 %v30_v8  ;;  %v29_v17 = vld [vmem:[%s1300_s2 + $0x8] sm:$0xff]  ;;  %v657_v1 = vld [vmem:[%s1301_s3 + $0x78] sm:$0xff]  ;;  %v656_v2 = vld [vmem:[%s1301_s3 + $0x70] sm:$0xff] }
   0xc   :  { %966 = vmatprep.mubr.msk.f32.mxu0 %vm34_vm0, %v1174_v10  ;;  %980 = vmatprep.subr.mxu0 %v204_v11  ;;  %v655_v3 = vld [vmem:[%s1301_s3 + $0x68] sm:$0xff]  ;;  %v654_v4 = vld [vmem:[%s1301_s3 + $0x60] sm:$0xff] }
   0xd   :  { %967 = vmatmul.mubr.msk.f32.vlgmr.msra.gmra.mxu0 %vm34_vm0, %v1182_v12  ;;  %991 = vmatprep.subr.mxu1 %v1099_v18 }
   0xe   :  { %981 = vmatpush3.msra.mxu0 %v204_v11  ;;  %988 = vmatprep.mubr.msk.f32.mxu0 %vm34_vm0, %v28_v13 }
   0xf   :  { %982 = vmatprep.subr.mxu0 %v203_v14  ;;  %993 = vmatprep.mubr.msk.f32.mxu1 %vm1100_vm1, %v1099_v18 }
  0x10   :  { %983 = vmatpush3.msra.mxu0 %v203_v14  ;;  %v1248_v14 = vld [vmem:[%s1302_s4 + $0x3] ss:$0 sm:$0xff] }
  0x11   :  { %984 = vmatprep.subr.mxu0 %v202_v15 }
  0x12   :  { %985 = vmatpush3.msra.mxu0 %v202_v15 }
  0x13   :  { %986 = vmatprep.subr.mxu0 %v201_v16 }
  0x14   :  { %987 = vmatpush3.msra.mxu0 %v201_v16 }
  0x15   :  { %989 = vmatmul.mubr.msk.f32.vlgmr.msra.gmra.mxu0 %vm34_vm0, %v29_v17  ;;  %1001 = vmatprep.subr.mxu0 %v1099_v18 }
  0x16   :  { %1003 = vmatprep.mubr.msk.f32.mxu0 %vm1100_vm1, %v1099_v18 }
  0xcb   :  { %v979_v19 = vpop.f32.mrf.mxu1 }
  0xcc   :  { %1002 = vmatpush3.xpose.msk.msra.mxu0 %vm34_vm0, %v979_v19 }
  0xcd   :  { %v968_v20 = vpop.f32.mrf.mxu0  ;;  %v192_v21 = vpop.f32.mrf.mxu1  ;;  %1011 = vmatprep.subr.mxu0 %v657_v1 }
  0xce   :  { %992 = vmatpush3.xpose.msk.msra.mxu1 %vm34_vm0, %v192_v21  ;;  %v748_v21 = vld [vmem:[%s1301_s3 + $0x98] sm:$0xff] }
  0xcf   :  { %1004 = vmatmul.mubr.msk.f32.vlgmr.msra.gmra.mxu0 %vm34_vm0, %v968_v20  ;;  %996 = vmatprep.subr.mxu1 %v1099_v18  ;;  %v107_v22 = vpop.f32.mrf.mxu0 }
  0xd0   :  { %1012 = vmatpush3.msra.mxu0 %v657_v1 }
  0xd1   :  { %994 = vmatmul.mubr.msk.f32.vlgmr.msra.gmra.mxu1 %vm34_vm0, %v107_v22  ;;  %1013 = vmatprep.subr.mxu0 %v656_v2  ;;  %v747_v22 = vld [vmem:[%s1301_s3 + $0x90] sm:$0xff] }
  0xd2   :  { %998 = vmatprep.mubr.msk.f32.mxu1 %vm1100_vm1, %v1099_v18  ;;  %1014 = vmatpush3.msra.mxu0 %v656_v2 }
  0xd3   :  { %1015 = vmatprep.subr.mxu0 %v655_v3 }
  0xd4   :  { %1016 = vmatpush3.msra.mxu0 %v655_v3 }
  0xd5   :  { %v990_v23 = vpop.f32.mrf.mxu0  ;;  %1017 = vmatprep.subr.mxu0 %v654_v4 }
  0xd6   :  { %1018 = vmatpush3.msra.mxu0 %v654_v4 }
  0xd7   :  { %v277_v24 = vpop.f32.mrf.mxu0 }
  0xd8   :  { %997 = vmatpush3.msra.mxu1 %v277_v24  ;;  %v745_v24 = vld [vmem:[%s1301_s3 + $0x80] sm:$0xff] }
  0xd9   :  { %1006 = vmatprep.subr.mxu1 %v1099_v18 }
 0x18f   :  { %v520_v25 = vpop.f32.mrf.mxu0 }
 0x190   :  { %v524_v30 = vsel %vm362_vm2, %v520_v25, -inf }
 0x191   :  { %v358_v26 = vpop.f32.mrf.mxu1  ;;  %v1005_v27 = vpop.f32.mrf.mxu0 }
 0x192   :  { %v363_v28 = vsel %vm362_vm2, %v358_v26, -inf }
 0x193   :  { %364 = vmax.xlane.f32.xlu0 %v363_v28  ;;  %v995_v29 = vpop.f32.mrf.mxu1 }
 0x197   :  { %525 = vmax.xlane.f32.xlu0 %v524_v30 }
 0x21c   :  { %v365_v31 = vpop.xlane.xlu0 %364 }
 0x21d   :  { %v366_v32 = vsub.f32 %v358_v26, %v365_v31 }
 0x21f   :  { %v367_v33 = vmul.f32 1.442695, %v366_v32  ;;  %v917_v32 = vld [vmem:[%s1302_s4 + $0x1] ss:$0 sm:$0xff] }
 0x220   :  { %v526_v34 = vpop.xlane.xlu0 %525 }
 0x221   :  { %1039 = vpow2.f32 %v367_v33  ;;  %v527_v35 = vsub.f32 %v520_v25, %v526_v34  ;;  %v914_v25 = vld [vmem:[%s1302_s4] ss:$0 sm:$0xff] }
 0x223   :  { %v528_v36 = vmul.f32 1.442695, %v527_v35 }
 0x225   :  { %1041 = vpow2.f32 %v528_v36 }
 0x22e   :  { %v1040_v37 = vpop.eup %1039 }
 0x22f   :  { %v369_v38 = vsel %vm362_vm2, %v1040_v37, 0.0 }
 0x230   :  { %370 = vadd.xlane.f32.xlu1 %v369_v38 }
 0x232   :  { %v1042_v39 = vpop.eup %1041 }
 0x233   :  { %v530_v40 = vsel %vm362_vm2, %v1042_v39, 0.0 }
 0x234   :  { %531 = vadd.xlane.f32.xlu1 %v530_v40 }
 0x2b9   :  { %v371_v41 = vpop.xlane.xlu1 %370 }
 0x2ba   :  { %1043 = vrcp.f32 %v371_v41 }
 0x2bd   :  { %v532_v42 = vpop.xlane.xlu1 %531 }
 0x2be   :  { %1045 = vrcp.f32 %v532_v42 }
 0x2c7   :  { %v1044_v43 = vpop.eup %1043 }
 0x2c8   :  { %v373_v44 = vmul.f32 %v1044_v43, %v1040_v37 }
 0x2ca   :  { %999 = vmatmul.mubr.msk.f32.vlgmr.msra.gmra.mxu1 %vm362_vm2, %v373_v44  ;;  %374 = vst.msk [vmem:[#allocation4] sm:$0xff] %vm362_vm2, %v373_v44 }
 0x2cb   :  { %v1046_v45 = vpop.eup %1045  ;;  %1007 = vmatpush3.msra.mxu1 %v990_v23  ;;  %1008 = vmatprep.mubr.msk.f32.mxu1 %vm1100_vm1, %v1099_v18  ;;  %v746_v23 = vld [vmem:[%s1301_s3 + $0x88] sm:$0xff]  ;;  %s1101_s3 = smov [#allocation4]  }
 0x2cc   :  { %v534_v46 = vmul.f32 %v1046_v45, %v1042_v39  ;;  %1022 = vmatprep.subr.mxu1 %v748_v21 }
 0x2ce   :  { %1009 = vmatmul.mubr.msk.f32.vlgmr.msra.gmra.mxu1 %vm362_vm2, %v534_v46  ;;  %535 = vst.msk [vmem:[#allocation4 + $0x8] sm:$0xff] %vm362_vm2, %v534_v46 }
 0x2cf   :  { %1023 = vmatpush3.msra.mxu1 %v748_v21 }
 0x2d0   :  { %1024 = vmatprep.subr.mxu1 %v747_v22 }
 0x2d1   :  { %1025 = vmatpush3.msra.mxu1 %v747_v22 }
 0x2d2   :  { %1026 = vmatprep.subr.mxu1 %v746_v23 }
 0x2d3   :  { %1027 = vmatpush3.msra.mxu1 %v746_v23 }
 0x2d4   :  { %1028 = vmatprep.subr.mxu1 %v745_v24 }
 0x2d5   :  { %1029 = vmatpush3.msra.mxu1 %v745_v24 }
 0x38a   :  { %v444_v47 = vpop.f32.mrf.mxu1 }
 0x38b   :  { %v613_v48 = vadd.f32 %v444_v47, %v1174_v10 }
 0x38c   :  { %v1000_v49 = vpop.f32.mrf.mxu1 }
 0x38d   :  { %v615_v50 = vsel %vm34_vm0, %v613_v48, 0.0 }
 0x38e   :  { %616 = vadd.xlane.f32.xlu0 %v615_v50  ;;  %v605_v51 = vpop.f32.mrf.mxu1 }
 0x38f   :  { %v614_v52 = vadd.f32 %v605_v51, %v1182_v12  ;;  %v1243_v12 = vld [vmem:[%s1302_s4 + $0x2] ss:$0 sm:$0xff]  ;;  %s885_s4 = sshll.u32 %s1101_s3, 4  ;;  %s886_s4 = int_to_ptr.vmem [resolvable:$true] %s885_s4 }
 0x390   :  { %v1010_v53 = vpop.f32.mrf.mxu1  ;;  %s1055_s28 = scalar_lea.vmem %s886_s4, 256  ;;  %p1060_p1 = scmp.lt.s32.totalorder %s886_s4, %s886_s4 }
 0x391   :  { %v618_v54 = vsel %vm34_vm0, %v614_v52, 0.0  ;;  %p1056_p0 = scmp.ne.s32.totalorder %s886_s4, %s1055_s28  ;;  %p1061_p2 = scmp.lt.s32.totalorder %s1055_s28, %s1055_s28 }
 0x392   :  { %619 = vadd.xlane.f32.xlu1 %v618_v54 }
 0x393   :  { %p1062_p3 = por %p1061_p2, %p1060_p1 }
 0x395   :  { %p1063_p4 = pnand %p1062_p3, %p1056_p0 }
 0x417   :  { %v617_v55 = vpop.xlane.xlu0 %616 }
 0x418   :  { %v622_v56 = vmul.f32 0.03125, %v617_v55 }
 0x41a   :  { %v624_v57 = vsub.f32 %v613_v48, %v622_v56 }
 0x41b   :  { %v620_v58 = vpop.xlane.xlu1 %619 }
 0x41c   :  { %v623_v59 = vmul.f32 0.03125, %v620_v58  ;;  %v626_v60 = vmul.f32 %v624_v57, %v624_v57 }
 0x41e   :  { %v625_v61 = vsub.f32 %v614_v52, %v623_v59  ;;  %v628_v62 = vsel %vm34_vm0, %v626_v60, 0.0 }
 0x41f   :  { %629 = vadd.xlane.f32.xlu0 %v628_v62 }
 0x420   :  { %v627_v63 = vmul.f32 %v625_v61, %v625_v61 }
 0x422   :  { %v631_v0 = vsel %vm34_vm0, %v627_v63, 0.0 }
 0x423   :  { %632 = vadd.xlane.f32.xlu1 %v631_v0 }
 0x4a8   :  { %v630_v5 = vpop.xlane.xlu0 %629 }
 0x4a9   :  { %v634_v6 = vmul.f32 0.03125, %v630_v5 }
 0x4ab   :  { %v636_v7 = vadd.f32 1e-06, %v634_v6 }
 0x4ac   :  { %v633_v8 = vpop.xlane.xlu1 %632 }
 0x4ad   :  { %1047 = vrsqrt.f32 %v636_v7  ;;  %v635_v9 = vmul.f32 0.03125, %v633_v8 }
 0x4af   :  { %v637_v10 = vadd.f32 1e-06, %v635_v9 }
 0x4b1   :  { %1049 = vrsqrt.f32 %v637_v10 }
 0x4ba   :  { %v1048_v11 = vpop.eup %1047 }
 0x4bb   :  { %v640_v13 = vmul.f32 %v1048_v11, %v624_v57 }
 0x4bd   :  { %v646_v15 = vmul.f32 %v1243_v12, %v640_v13 }
 0x4be   :  { %v1050_v16 = vpop.eup %1049 }
 0x4bf   :  { %v641_v17 = vmul.f32 %v1050_v16, %v625_v61  ;;  %v652_v18 = vadd.f32 %v1248_v14, %v646_v15 }
 0x4c1   :  { %1019 = vmatprep.mubr.msk.f32.mxu0 %vm34_vm0, %v652_v18  ;;  %v647_v19 = vmul.f32 %v1243_v12, %v641_v17 }
 0x4c3   :  { %v653_v20 = vadd.f32 %v1248_v14, %v647_v19 }
 0x4c5   :  { %1020 = vmatmul.mubr.msk.f32.vlgmr.msra.gmra.mxu0 %vm34_vm0, %v653_v20 }
 0x585   :  { %v1021_v26 = vpop.f32.mrf.mxu0 }
 0x586   :  { %v740_v27 = vadd.f32 %v1021_v26, %v914_v25 }
 0x587   :  { %v734_v28 = vpop.f32.mrf.mxu0 }
 0x588   :  { %v735_v29 = vadd.f32 %v914_v25, %v734_v28  ;;  %v744_v31 = vmax.f32 %v740_v27, 0.0 }
 0x58a   :  { %v743_v30 = vmax.f32 %v735_v29, 0.0 }
 0x58c   :  { %1030 = vmatprep.mubr.msk.f32.mxu1 %vm34_vm0, %v743_v30 }
 0x58d   :  { %1031 = vmatmul.mubr.msk.f32.vlgmr.msra.gmra.mxu1 %vm34_vm0, %v744_v31 }
 0x64d   :  { %v1032_v33 = vpop.f32.mrf.mxu1 }
 0x64e   :  { %v831_v34 = vadd.f32 %v1032_v33, %v917_v32 }
 0x64f   :  { %v825_v35 = vpop.f32.mrf.mxu1 }
 0x650   :  { %v826_v36 = vadd.f32 %v917_v32, %v825_v35  ;;  %v835_v37 = vadd.f32 %v831_v34, %v653_v20 }
 0x652   :  { %v839_v38 = vsel %vm34_vm0, %v835_v37, 0.0  ;;  %v834_v39 = vadd.f32 %v826_v36, %v652_v18 }
 0x653   :  { %840 = vadd.xlane.f32.xlu1 %v839_v38 }
 0x654   :  { %v836_v40 = vsel %vm34_vm0, %v834_v39, 0.0 }
 0x655   :  { %837 = vadd.xlane.f32.xlu0 %v836_v40 }
 0x6dc   :  { %v841_v41 = vpop.xlane.xlu1 %840 }
 0x6dd   :  { %v843_v42 = vmul.f32 0.03125, %v841_v41 }
 0x6de   :  { %v838_v43 = vpop.xlane.xlu0 %837 }
 0x6df   :  { %v845_v44 = vsub.f32 %v835_v37, %v843_v42  ;;  %v842_v45 = vmul.f32 0.03125, %v838_v43 }
 0x6e1   :  { %v844_v46 = vsub.f32 %v834_v39, %v842_v45  ;;  %v847_v47 = vmul.f32 %v845_v44, %v845_v44 }
 0x6e3   :  { %v851_v48 = vsel %vm34_vm0, %v847_v47, 0.0  ;;  %v846_v49 = vmul.f32 %v844_v46, %v844_v46 }
 0x6e4   :  { %852 = vadd.xlane.f32.xlu1 %v851_v48 }
 0x6e5   :  { %v848_v50 = vsel %vm34_vm0, %v846_v49, 0.0 }
 0x6e6   :  { %849 = vadd.xlane.f32.xlu0 %v848_v50 }
 0x6e7   :  { %1066 = shalt.err (!%p1063_p4)
}
 0x6e8   :  { %s1102_s29 = smov 128   ;;  %s1103_s30 = smov 8  }
 0x6e9   :  { %891 = dma.vmem_to_hbm [thread:$0]  %s886_s4, 256, %s1304_s6, [#allocation5], %s1102_s29, %s1102_s29, %s1103_s30  }
 0x6ea   :  { %s1104_s8 = smov [#allocation2]  }
 0x6eb   :  { %s873_s9 = sshll.u32 %s1104_s8, 4  ;;  %s874_s9 = int_to_ptr.vmem [resolvable:$true] %s873_s9 }
 0x6ec   :  { %s1075_s6 = scalar_lea.vmem %s874_s9, 256  ;;  %p1080_p6 = scmp.lt.s32.totalorder %s874_s9, %s874_s9 }
 0x6ed   :  { %p1076_p5 = scmp.ne.s32.totalorder %s874_s9, %s1075_s6  ;;  %p1081_p7 = scmp.lt.s32.totalorder %s1075_s6, %s1075_s6 }
 0x6ef   :  { %p1082_p8 = por %p1081_p7, %p1080_p6 }
 0x6f1   :  { %p1083_p9 = pnand %p1082_p8, %p1076_p5 }
 0x76d   :  { %v853_v51 = vpop.xlane.xlu1 %852 }
 0x76e   :  { %v855_v52 = vmul.f32 0.03125, %v853_v51 }
 0x76f   :  { %v850_v53 = vpop.xlane.xlu0 %849 }
 0x770   :  { %v857_v54 = vadd.f32 1e-06, %v855_v52  ;;  %v854_v55 = vmul.f32 0.03125, %v850_v53 }
 0x772   :  { %1051 = vrsqrt.f32 %v857_v54  ;;  %v856_v56 = vadd.f32 1e-06, %v854_v55 }
 0x774   :  { %1053 = vrsqrt.f32 %v856_v56 }
 0x77f   :  { %v1052_v57 = vpop.eup %1051 }
 0x780   :  { %v861_v58 = vmul.f32 %v1052_v57, %v845_v44 }
 0x781   :  { %v1054_v59 = vpop.eup %1053 }
 0x782   :  { %v860_v60 = vmul.f32 %v1054_v59, %v844_v46  ;;  %v863_v61 = vmul.f32 %v1243_v12, %v861_v58 }
 0x784   :  { %v862_v62 = vmul.f32 %v1243_v12, %v860_v60  ;;  %v865_v63 = vadd.f32 %v1248_v14, %v863_v61 }
 0x786   :  { %v864_v0 = vadd.f32 %v1248_v14, %v862_v62  ;;  %867 = vst.msk [vmem:[#allocation2 + $0x8] sm:$0xff] %vm34_vm0, %v865_v63 }
 0x788   :  { %866 = vst.msk [vmem:[#allocation2] sm:$0xff] %vm34_vm0, %v864_v0 }
 0x789   :  { %1086 = shalt.err (!%p1083_p9)
}
 0x78a   :  { %879 = dma.vmem_to_hbm [thread:$0]  %s874_s9, 256, %s1303_s5, [#allocation3], %s1102_s29, %s1102_s29, %s1103_s30  }
 0x78b   :  { %1095 = dma.done.wait [#allocation3], 256  }
 0x78c   :  { %1096 = vsyncadd [#allocation3], 4294967040 }
 0x78d   :  { %1097 = dma.done.wait [#allocation5], 256  }
 0x78e   :  { %1098 = vsyncadd [#allocation5], 4294967040 }
 0x78f   :  { %898 = vsyncpa [#allocation3], 1 }
 0x790   :  { %899 = vsyncpa [#allocation5], 1 }

</bundles_post_ra>
